<compile_context>
chip_gen: v6e
topology: v6e:2x2x1
jax: 0.10.0
libtpu: 0.0.40
codegen_flags: <defaults>
</compile_context>

<pallas_src>
import functools

import jax
import jax.numpy as jnp
from jax.experimental import pallas as pl
from jax.experimental.pallas import tpu as pltpu

_LANE = 128


def _cdiv(a, b):
    return (a + b - 1) // b


def _round_up(a, b):
    return _cdiv(a, b) * b


def _binary_category_kernel(params_ref, x_ref, o_ref):
    # params_ref: (3,) float32 in SMEM -> [w0, w1, b]
    # x_ref:      (2, tile_rows, 128) lane-dense input planes (x plane, y plane)
    # o_ref:      (tile_rows, 128) lane-dense output block
    w0 = params_ref[0]
    w1 = params_ref[1]
    b = params_ref[2]
    logits = x_ref[0] * w0 + x_ref[1] * w1 + b            # pure VPU FMAs
    # Single-transcendental sigmoid: exactly one EUP tanh per element.
    o_ref[...] = (0.5 * jnp.tanh(0.5 * logits) + 0.5).astype(o_ref.dtype)


def _pick_tile_rows(rows, max_tile_rows):
    max_tile_rows = max(8, (max_tile_rows // 8) * 8)
    if rows <= 8:
        return rows  # single tiny tile; block dim == full dim is always legal
    # >= 2 grid steps (pipelining + v7x dual-TC sharding); multiple of 8 sublanes
    # so partial last blocks remain legal.
    return min(max_tile_rows, _round_up(_cdiv(rows, 2), 8))


def _forward_planes(params, x_planes, max_tile_rows):
    # x_planes: (2, rows, 128) float32
    rows = x_planes.shape[1]
    tile_rows = _pick_tile_rows(rows, max_tile_rows)
    grid = (_cdiv(rows, tile_rows),)  # last block may be partial; edge writes are masked
    return pl.pallas_call(
        _binary_category_kernel,
        out_shape=jax.ShapeDtypeStruct((rows, _LANE), x_planes.dtype),
        grid=grid,
        in_specs=[
            pl.BlockSpec(memory_space=pltpu.MemorySpace.SMEM),          # (3,) params
            pl.BlockSpec((2, tile_rows, _LANE), lambda i: (0, i, 0)),   # input planes
        ],
        out_specs=pl.BlockSpec((tile_rows, _LANE), lambda i: (i, 0)),   # lane-dense out
        compiler_params=pltpu.CompilerParams(
            dimension_semantics=("parallel",),
            # Allow XLA to fold the wrapper transpose/pad producer into the
            # Pallas input operand instead of materializing a second HBM copy.
            allow_input_fusion=[False, True],
        ),
    )(params, x_planes)


def _pack_params(weight, bias):
    # PyTorch Linear(2, 1): weight (1, 2), bias (1,)  ->  [w0, w1, b]
    return jnp.concatenate([weight.reshape(-1), bias.reshape(-1)]).astype(jnp.float32)


def _finalize(out, B, pad_B):
    if pad_B != B:
        return out.reshape(pad_B, 1)[:B]
    return out.reshape(B, 1)  # free: pure row-major view, no copy


@functools.partial(jax.jit, static_argnames=("max_tile_rows",))
def binary_category_forward(xy, weight, bias, *, max_tile_rows=2048):
    """PyTorch-shaped entry point. xy: (B, 2); weight: (1, 2); bias: (1,). Returns (B, 1)."""
    B = xy.shape[0]
    rows = _cdiv(B, _LANE)
    pad_B = rows * _LANE
    xy_t = jnp.transpose(xy)                          # (2, B) -- candidate for input fusion
    if pad_B != B:
        xy_t = jnp.pad(xy_t, ((0, 0), (0, pad_B - B)))
    x_planes = xy_t.reshape(2, rows, _LANE)
    out = _forward_planes(_pack_params(weight, bias), x_planes, max_tile_rows)
    return _finalize(out, B, pad_B)


@functools.partial(jax.jit, static_argnames=("max_tile_rows",))
def binary_category_forward_planar(x_planar, weight, bias, *, max_tile_rows=2048):
    """Zero-extra-pass entry point. x_planar: (2, B), row 0 = x coords, row 1 = y coords."""
    B = x_planar.shape[1]
    rows = _cdiv(B, _LANE)
    pad_B = rows * _LANE
    if pad_B != B:
        x_planar = jnp.pad(x_planar, ((0, 0), (0, pad_B - B)))
    x_planes = x_planar.reshape(2, rows, _LANE)
    out = _forward_planes(_pack_params(weight, bias), x_planes, max_tile_rows)
    return _finalize(out, B, pad_B)


if __name__ == "__main__":
    key = jax.random.PRNGKey(0)
    k_x, k_w, k_b, k_x2, k_x3 = jax.random.split(key, 5)

    # PyTorch Linear(2, 1): weight (1, 2), bias (1,).
    bound = 1.0 / jnp.sqrt(2.0)
    weight = jax.random.uniform(k_w, (1, 2), minval=-bound, maxval=bound, dtype=jnp.float32)
    bias = jax.random.uniform(k_b, (1,), minval=-bound, maxval=bound, dtype=jnp.float32)

    def ref_fn(pts):
        return jax.nn.sigmoid(pts @ weight.T + bias)

    # Tolerance: the kernel uses the tanh-form sigmoid (single EUP op); it matches
    # the exp-form reference to a few f32 ulps, so 1e-5 is still a tight check.
    TOL = 1e-5

    # 1) Small batch, PyTorch-shaped (B, 2) path: single tiny tile + 128-padding.
    batch = 8
    xy = jax.random.normal(k_x, (batch, 2), dtype=jnp.float32)
    out = jax.block_until_ready(binary_category_forward(xy, weight, bias))
    assert out.shape == (batch, 1)
    assert jnp.allclose(out, ref_fn(xy), atol=TOL), (out, ref_fn(xy))

    # 2) Non-multiple-of-128 batch: exercises the pad + output-slice path.
    batch2 = 300
    xy2 = jax.random.normal(k_x2, (batch2, 2), dtype=jnp.float32)
    out2 = jax.block_until_ready(binary_category_forward(xy2, weight, bias))
    assert out2.shape == (batch2, 1)
    assert jnp.allclose(out2, ref_fn(xy2), atol=TOL)

    # 3) Multi-tile grid with a partial last block (rows = 33 -> tile_rows = 24,
    #    grid = 2), via the planar (2, B) calling convention (no transpose pass).
    batch3 = 33 * _LANE
    xy3 = jax.random.normal(k_x3, (batch3, 2), dtype=jnp.float32)
    out3 = jax.block_until_ready(binary_category_forward_planar(xy3.T, weight, bias))
    assert out3.shape == (batch3, 1)
    assert jnp.allclose(out3, ref_fn(xy3), atol=TOL)

    print("KERNEL_OK")
</pallas_src>

<mosaic_0001>
module attributes {stable_mosaic.version = 11 : i64} {
  func.func @_binary_category_kernel(%arg0: i32, %arg1: memref<3xf32, #tpu.memory_space<smem>>, %arg2: memref<2x1x128xf32, #tpu.memory_space<vmem>>, %arg3: memref<1x128xf32, #tpu.memory_space<vmem>>) attributes {dimension_semantics = [#tpu.dimension_semantics<parallel>], iteration_bounds = array<i64: 1>, scalar_prefetch = 0 : i64, scratch_operands = 0 : i64, tpu.core_type = #tpu.core_type<tc>, window_params = [{transform_indices = @transform_0, window_bounds = array<i64: 3>}, {transform_indices = @transform_1, window_bounds = array<i64: 2, 1, 128>}, {transform_indices = @transform_2, window_bounds = array<i64: 1, 128>}]} {
    %c0 = arith.constant 0 : index
    %0 = memref.load %arg1[%c0] : memref<3xf32, #tpu.memory_space<smem>>
    %c1 = arith.constant 1 : index
    %1 = memref.load %arg1[%c1] : memref<3xf32, #tpu.memory_space<smem>>
    %c2 = arith.constant 2 : index
    %2 = memref.load %arg1[%c2] : memref<3xf32, #tpu.memory_space<smem>>
    %c0_0 = arith.constant 0 : index
    %c0_1 = arith.constant 0 : index
    %c0_2 = arith.constant 0 : index
    %3 = vector.load %arg2[%c0_0, %c0_1, %c0_2] : memref<2x1x128xf32, #tpu.memory_space<vmem>>, vector<1x1x128xf32>
    %4 = vector.shape_cast %3 : vector<1x1x128xf32> to vector<1x128xf32>
    %5 = vector.broadcast %0 : f32 to vector<1x128xf32>
    %6 = arith.mulf %4, %5 : vector<1x128xf32>
    %c1_3 = arith.constant 1 : index
    %c0_4 = arith.constant 0 : index
    %c0_5 = arith.constant 0 : index
    %7 = vector.load %arg2[%c1_3, %c0_4, %c0_5] : memref<2x1x128xf32, #tpu.memory_space<vmem>>, vector<1x1x128xf32>
    %8 = vector.shape_cast %7 : vector<1x1x128xf32> to vector<1x128xf32>
    %9 = vector.broadcast %1 : f32 to vector<1x128xf32>
    %10 = arith.mulf %8, %9 : vector<1x128xf32>
    %11 = arith.addf %6, %10 : vector<1x128xf32>
    %12 = vector.broadcast %2 : f32 to vector<1x128xf32>
    %13 = arith.addf %11, %12 : vector<1x128xf32>
    %cst = arith.constant 5.000000e-01 : f32
    %14 = vector.broadcast %cst : f32 to vector<1x128xf32>
    %15 = arith.mulf %14, %13 : vector<1x128xf32>
    %16 = math.tanh %15 : vector<1x128xf32>
    %cst_6 = arith.constant 5.000000e-01 : f32
    %17 = vector.broadcast %cst_6 : f32 to vector<1x128xf32>
    %18 = arith.mulf %17, %16 : vector<1x128xf32>
    %cst_7 = arith.constant 5.000000e-01 : f32
    %19 = vector.broadcast %cst_7 : f32 to vector<1x128xf32>
    %20 = arith.addf %18, %19 : vector<1x128xf32>
    %c0_8 = arith.constant 0 : index
    %c0_9 = arith.constant 0 : index
    %21 = vector.load %arg3[%c0_8, %c0_9] : memref<1x128xf32, #tpu.memory_space<vmem>>, vector<1x128xf32>
    tpu.vector_store %arg3[%c0_8, %c0_9], %20 {strides = array<i32>} : memref<1x128xf32, #tpu.memory_space<vmem>>, vector<1x128xf32>,
    return
  }
  func.func @transform_0(%arg0: i32) -> i32 {
    %c0_i32 = arith.constant 0 : i32
    %c0_i32_0 = arith.constant 0 : i32
    return %c0_i32 : i32
  }
  func.func @transform_1(%arg0: i32) -> (i32, i32, i32) {
    %c0_i32 = arith.constant 0 : i32
    %c0_i32_0 = arith.constant 0 : i32
    %c0_i32_1 = arith.constant 0 : i32
    return %c0_i32, %arg0, %c0_i32_0 : i32, i32, i32
  }
  func.func @transform_2(%arg0: i32) -> (i32, i32) {
    %c0_i32 = arith.constant 0 : i32
    %c0_i32_0 = arith.constant 0 : i32
    return %arg0, %c0_i32 : i32, i32
  }
}

</mosaic_0001>

<bundles_post_ra>
// kernel: binary_category_forward.1
= control target key start
LH: loop header
LB: loop body
LE: loop exit
PB: predicated region body
PF: predicated region fallthrough
CT: control target
= control target key end

     0   :  { %7 = vsyncpa [#allocation3], 0  ;;  %s95_s0 = inlined_call_operand.vmem [shape: f32[3], index: 0, kind: input, shape index: {}]   ;;  %s96_s1 = inlined_call_operand.vmem [shape: f32[2,1,128], index: 1, kind: input, shape index: {}]   ;;  %s97_s2 = inlined_call_operand.vmem [shape: f32[1,128], index: 2, kind: output, shape index: {}]  }
   0x1   :  { %s14_s11 = sshll.u32 %s95_s0, 4  ;;  %s15_s11 = int_to_ptr.vmem [resolvable:$true] %s14_s11 }
   0x2   :  { %s53_s12 = scalar_lea.vmem %s15_s11, 16  ;;  %p58_p1 = scmp.lt.s32.totalorder %s15_s11, %s15_s11 }
   0x3   :  { %p54_p0 = scmp.ne.s32.totalorder %s15_s11, %s53_s12  ;;  %p59_p2 = scmp.lt.s32.totalorder %s53_s12, %s53_s12 }
   0x5   :  { %p60_p3 = por %p59_p2, %p58_p1 }
   0x7   :  { %p61_p4 = pnand %p60_p3, %p54_p0 }
   0x9   :  { %64 = shalt.err (!%p61_p4)
}
   0xa   :  { %s67_s13 = smov [#allocation2]  }
   0xb   :  { %17 = dma.vmem_to_smem %s15_s11, 16, %s67_s13, [#allocation3]  }
   0xc   :  { %65 = dma.done.wait [#allocation3], 16  }
   0xd   :  { %66 = vsyncadd [#allocation3], 4294967280 }
   0xe   :  { %23 = sfence }
   0xf   :  { %s24_s14 = sld [smem:[#allocation2]]  ;;  %v27_v0 = vld [vmem:[%s96_s1] sm:$0x1]  ;;  %v49_v1 = vld [vmem:[%s96_s1 + $0x1] sm:$0x1] }
  0x10   :  { %s47_s15 = sld [smem:[#allocation2 + $0x1]] }
  0x11   :  { %s48_s16 = sld [smem:[#allocation2 + $0x2]] }
  0x15   :  { %v28_v2 = vstv %s24_s14 }
  0x16   :  { %v29_v3 = vmul.f32 %v28_v2, %v27_v0  ;;  %v32_v4 = vstv %s47_s15 }
  0x17   :  { %v33_v5 = vmul.f32 %v49_v1, %v32_v4  ;;  %v35_v6 = vstv %s48_s16 }
  0x19   :  { %v34_v7 = vadd.f32 %v33_v5, %v29_v3 }
  0x1b   :  { %v36_v8 = vadd.f32 %v35_v6, %v34_v7 }
  0x1d   :  { %v37_v9 = vmul.f32 0.5, %v36_v8 }
  0x1f   :  { %51 = vtanh.f32 %v37_v9 }
  0x2c   :  { %v52_v10 = vpop.eup %51 }
  0x2d   :  { %v39_v11 = vmul.f32 0.5, %v52_v10 }
  0x2f   :  { %v40_v12 = vadd.f32 0.5, %v39_v11 }
  0x31   :  { %41 = vst [vmem:[%s97_s2] sm:$0x1] %v40_v12 }
  0x32   :  { %46 = vsyncpa [#allocation3], 1 }

</bundles_post_ra>
